<compile_context>
chip_gen: v5e
topology: v5e:2x2
jax: 0.10.0
libtpu: 0.0.40
codegen_flags: <defaults>
</compile_context>

<pallas_src>
import functools

import jax
import jax.numpy as jnp
import numpy as np
from jax.experimental import pallas as pl
from jax.experimental.pallas import tpu as pltpu


def _round_up(x, m):
    return ((x + m - 1) // m) * m


# ---------------------------------------------------------------------------
# Pass 1: tiled im2col GEMM + per-tile partial BN statistics.
# ---------------------------------------------------------------------------
def _conv_stats_kernel(xcol_ref, w_ref, y_ref, stats_ref):
    # xcol_ref : (TM, Kp)  activation tile (compute dtype, streamed)
    # w_ref    : (Kp, Cp)  weight matrix (compute dtype, resident)
    # y_ref    : (TM, Cp)  f32 pre-BN conv output tile
    # stats_ref: (8,  Cp)  row 0 = sum over tile rows, row 1 = sum of squares
    y = jnp.dot(xcol_ref[...], w_ref[...], preferred_element_type=jnp.float32)
    y_ref[...] = y
    s = jnp.sum(y, axis=0, keepdims=True)          # (1, Cp)
    ss = jnp.sum(y * y, axis=0, keepdims=True)     # (1, Cp)
    row = jax.lax.broadcasted_iota(jnp.int32, stats_ref.shape, 0)
    stats_ref[...] = jnp.where(row == 0, s, 0.0) + jnp.where(row == 1, ss, 0.0)


# ---------------------------------------------------------------------------
# Pass 2: affine batch-norm (precomputed scale/shift) + LeakyReLU(0.01).
# ---------------------------------------------------------------------------
def _bn_lrelu_kernel(y_ref, scale_ref, shift_ref, o_ref):
    z = y_ref[...] * scale_ref[...] + shift_ref[...]
    o_ref[...] = jnp.where(z >= 0, z, 0.01 * z).astype(o_ref.dtype)


@functools.partial(
    jax.jit,
    static_argnames=("kernel_size", "padding", "stride", "eps", "block_m",
                     "compute_dtype"))
def single_conv_forward(x_nchw, weight, bias, gamma, beta, *, kernel_size,
                        padding, stride, eps=1e-5, block_m=256,
                        compute_dtype=jnp.bfloat16):
    """SingleConv forward: Conv2d -> BatchNorm2d (batch stats) -> LeakyReLU.

    x_nchw : (N, Cin, H, W)      f32
    weight : (Cout, Cin, KH, KW) f32 (PyTorch OIHW)
    bias, gamma, beta : (Cout,)  f32
    """
    del bias  # exactly cancelled by train-mode BN mean subtraction
    N, Cin, H, W = x_nchw.shape
    Cout = weight.shape[0]
    KH = KW = kernel_size
    Ho = (H + 2 * padding - KH) // stride + 1
    Wo = (W + 2 * padding - KW) // stride + 1
    M = N * Ho * Wo
    K = KH * KW * Cin

    # ---- glue: NCHW -> NHWC, spatial pad, im2col (plain JAX) ----------------
    x = jnp.transpose(x_nchw, (0, 2, 3, 1))
    xp = jnp.pad(x, ((0, 0), (padding, padding), (padding, padding), (0, 0)))
    patches = []
    for kh in range(KH):
        for kw in range(KW):
            patches.append(
                xp[:, kh:kh + (Ho - 1) * stride + 1:stride,
                      kw:kw + (Wo - 1) * stride + 1:stride, :])
    # column index = ((kh*KW + kw)*Cin + cin)
    xcol = jnp.concatenate(patches, axis=-1).reshape(M, K)
    # weight OIHW -> (KH*KW*Cin, Cout) in matching column order
    w_mat = jnp.transpose(weight, (2, 3, 1, 0)).reshape(K, Cout)

    # ---- TPU-friendly padding: lane-dense Cp, MXU-friendly Kp, row tiles ----
    Kp = _round_up(K, 128)
    Cp = _round_up(Cout, 128)
    tm = min(block_m, _round_up(M, 8))
    Mp = _round_up(M, tm)
    nt = Mp // tm

    xcol_p = jnp.pad(xcol, ((0, Mp - M), (0, Kp - K))).astype(compute_dtype)
    w_p = jnp.pad(w_mat, ((0, Kp - K), (0, Cp - Cout))).astype(compute_dtype)

    # ---- pass 1: tiled conv GEMM + per-tile partial stats -------------------
    y_flat, stats = pl.pallas_call(
        _conv_stats_kernel,
        grid=(nt,),
        in_specs=[
            pl.BlockSpec((tm, Kp), lambda i: (i, 0)),   # streamed activations
            pl.BlockSpec((Kp, Cp), lambda i: (0, 0)),   # resident weights
        ],
        out_specs=(
            pl.BlockSpec((tm, Cp), lambda i: (i, 0)),
            pl.BlockSpec((8, Cp), lambda i: (i, 0)),
        ),
        out_shape=(
            jax.ShapeDtypeStruct((Mp, Cp), jnp.float32),
            jax.ShapeDtypeStruct((nt * 8, Cp), jnp.float32),
        ),
        compiler_params=pltpu.CompilerParams(
            dimension_semantics=("parallel",),
            vmem_limit_bytes=48 << 20,   # headroom under v7x's 64 MiB physical
        ),
    )(xcol_p, w_p)

    # ---- tiny fold: batch mean/var -> fused scale/shift (plain JAX) ---------
    totals = stats.reshape(nt, 8, Cp).sum(axis=0)
    mean = totals[0] / M                               # padded rows are zeros
    var = jnp.maximum(totals[1] / M - mean * mean, 0.0)  # biased batch variance
    gamma_p = jnp.pad(gamma.astype(jnp.float32), (0, Cp - Cout))
    beta_p = jnp.pad(beta.astype(jnp.float32), (0, Cp - Cout))
    scale = (gamma_p * jax.lax.rsqrt(var + eps)).reshape(1, Cp)
    shift = (beta_p - mean * gamma_p * jax.lax.rsqrt(var + eps)).reshape(1, Cp)

    # ---- pass 2: in-place normalize + LeakyReLU over the y tiles ------------
    out_flat = pl.pallas_call(
        _bn_lrelu_kernel,
        grid=(nt,),
        in_specs=[
            pl.BlockSpec((tm, Cp), lambda i: (i, 0)),
            pl.BlockSpec((1, Cp), lambda i: (0, 0)),
            pl.BlockSpec((1, Cp), lambda i: (0, 0)),
        ],
        out_specs=pl.BlockSpec((tm, Cp), lambda i: (i, 0)),
        out_shape=jax.ShapeDtypeStruct((Mp, Cp), jnp.float32),
        input_output_aliases={0: 0},    # reuse y's HBM buffer for the output
        compiler_params=pltpu.CompilerParams(
            dimension_semantics=("parallel",)),
    )(y_flat, scale, shift)

    out = out_flat[:M, :Cout].reshape(N, Ho, Wo, Cout)
    return jnp.transpose(out, (0, 3, 1, 2))


# ---------------------------------------------------------------------------
# Pure-JAX reference (PyTorch train-mode semantics).
# ---------------------------------------------------------------------------
def _reference(x, weight, bias, gamma, beta, *, stride, padding, eps=1e-5,
               conv_input_dtype=jnp.float32):
    xc = x.astype(conv_input_dtype).astype(jnp.float32)
    wc = weight.astype(conv_input_dtype).astype(jnp.float32)
    y = jax.lax.conv_general_dilated(
        xc, wc, window_strides=(stride, stride),
        padding=[(padding, padding), (padding, padding)],
        dimension_numbers=("NCHW", "OIHW", "NCHW"))
    y = y + bias[None, :, None, None]
    mean = y.mean(axis=(0, 2, 3), keepdims=True)
    var = ((y - mean) ** 2).mean(axis=(0, 2, 3), keepdims=True)
    y_hat = (y - mean) * jax.lax.rsqrt(var + eps)
    z = y_hat * gamma[None, :, None, None] + beta[None, :, None, None]
    return jnp.where(z >= 0, z, 0.01 * z)


if __name__ == "__main__":
    key = jax.random.PRNGKey(0)
    kx, k1w, k1b, k1g, k1be, k2w, k2b, k2g, k2be = jax.random.split(key, 9)

    # ClassNet meta-data path at small scale: SingleConv(4, 32, 3, 1, 1)
    # followed by a stride-2 SingleConv(32, 64, 3, 1, 2).
    N, Cin, H, W = 2, 4, 16, 16
    C1, C2 = 32, 64

    x = jax.random.normal(kx, (N, Cin, H, W), dtype=jnp.float32)

    w1 = 0.1 * jax.random.normal(k1w, (C1, Cin, 3, 3), dtype=jnp.float32)
    b1 = 0.05 * jax.random.normal(k1b, (C1,), dtype=jnp.float32)
    g1 = 1.0 + 0.1 * jax.random.normal(k1g, (C1,), dtype=jnp.float32)
    be1 = 0.1 * jax.random.normal(k1be, (C1,), dtype=jnp.float32)

    w2 = 0.1 * jax.random.normal(k2w, (C2, C1, 3, 3), dtype=jnp.float32)
    b2 = 0.05 * jax.random.normal(k2b, (C2,), dtype=jnp.float32)
    g2 = 1.0 + 0.1 * jax.random.normal(k2g, (C2,), dtype=jnp.float32)
    be2 = 0.1 * jax.random.normal(k2be, (C2,), dtype=jnp.float32)

    # --- exactness: f32 compute path vs f32 reference (two stacked layers) ---
    o1 = single_conv_forward(x, w1, b1, g1, be1, kernel_size=3, padding=1,
                             stride=1, compute_dtype=jnp.float32)
    o2 = single_conv_forward(o1, w2, b2, g2, be2, kernel_size=3, padding=1,
                             stride=2, compute_dtype=jnp.float32)
    o2 = jax.block_until_ready(o2)

    r1 = _reference(x, w1, b1, g1, be1, stride=1, padding=1)
    r2 = _reference(r1, w2, b2, g2, be2, stride=2, padding=1)
    np.testing.assert_allclose(np.asarray(o1), np.asarray(r1), atol=1e-4, rtol=1e-4)
    np.testing.assert_allclose(np.asarray(o2), np.asarray(r2), atol=1e-4, rtol=1e-4)

    # --- default fast path: bf16 MXU inputs, f32 accumulation / BN stats -----
    f1 = jax.block_until_ready(
        single_conv_forward(x, w1, b1, g1, be1, kernel_size=3, padding=1,
                            stride=1))
    rb1 = _reference(x, w1, b1, g1, be1, stride=1, padding=1,
                     conv_input_dtype=jnp.bfloat16)   # same input rounding
    np.testing.assert_allclose(np.asarray(f1), np.asarray(rb1), atol=1e-4, rtol=1e-3)
    np.testing.assert_allclose(np.asarray(f1), np.asarray(r1), atol=5e-2, rtol=5e-2)

    print("KERNEL_OK")
</pallas_src>

<mosaic_0001>
module attributes {stable_mosaic.version = 11 : i64} {
  func.func @_bn_lrelu_kernel(%arg0: i32, %arg1: memref<256x128xf32, #tpu.memory_space<vmem>>, %arg2: memref<1x128xf32, #tpu.memory_space<vmem>>, %arg3: memref<1x128xf32, #tpu.memory_space<vmem>>, %arg4: memref<256x128xf32, #tpu.memory_space<vmem>>) attributes {dimension_semantics = [#tpu.dimension_semantics<parallel>], iteration_bounds = array<i64: 2>, scalar_prefetch = 0 : i64, scratch_operands = 0 : i64, tpu.core_type = #tpu.core_type<tc>, window_params = [{transform_indices = @transform_0, window_bounds = array<i64: 256, 128>}, {pipeline_mode = #tpu.pipeline_mode<synchronous>, transform_indices = @transform_1, window_bounds = array<i64: 1, 128>}, {pipeline_mode = #tpu.pipeline_mode<synchronous>, transform_indices = @transform_2, window_bounds = array<i64: 1, 128>}, {transform_indices = @transform_3, window_bounds = array<i64: 256, 128>}]} {
    %c0 = arith.constant 0 : index
    %c0_0 = arith.constant 0 : index
    %0 = vector.load %arg1[%c0, %c0_0] : memref<256x128xf32, #tpu.memory_space<vmem>>, vector<256x128xf32>
    %c0_1 = arith.constant 0 : index
    %c0_2 = arith.constant 0 : index
    %1 = vector.load %arg2[%c0_1, %c0_2] : memref<1x128xf32, #tpu.memory_space<vmem>>, vector<1x128xf32>
    %2 = vector.broadcast %1 : vector<1x128xf32> to vector<256x128xf32>
    %3 = arith.mulf %0, %2 : vector<256x128xf32>
    %c0_3 = arith.constant 0 : index
    %c0_4 = arith.constant 0 : index
    %4 = vector.load %arg3[%c0_3, %c0_4] : memref<1x128xf32, #tpu.memory_space<vmem>>, vector<1x128xf32>
    %5 = vector.broadcast %4 : vector<1x128xf32> to vector<256x128xf32>
    %6 = arith.addf %3, %5 : vector<256x128xf32>
    %cst = arith.constant 0.000000e+00 : f32
    %7 = vector.broadcast %cst : f32 to vector<256x128xf32>
    %8 = arith.cmpf oge, %6, %7 : vector<256x128xf32>
    %cst_5 = arith.constant 0.00999999977 : f32
    %9 = vector.broadcast %cst_5 : f32 to vector<256x128xf32>
    %10 = arith.mulf %9, %6 : vector<256x128xf32>
    %11 = arith.select %8, %6, %10 : vector<256x128xi1>, vector<256x128xf32>
    %c0_6 = arith.constant 0 : index
    %c0_7 = arith.constant 0 : index
    %12 = vector.load %arg4[%c0_6, %c0_7] : memref<256x128xf32, #tpu.memory_space<vmem>>, vector<256x128xf32>
    tpu.vector_store %arg4[%c0_6, %c0_7], %11 {strides = array<i32>} : memref<256x128xf32, #tpu.memory_space<vmem>>, vector<256x128xf32>,
    return
  }
  func.func @transform_0(%arg0: i32) -> (i32, i32) {
    %c0_i32 = arith.constant 0 : i32
    %c0_i32_0 = arith.constant 0 : i32
    return %arg0, %c0_i32 : i32, i32
  }
  func.func @transform_1(%arg0: i32) -> (i32, i32) {
    %c0_i32 = arith.constant 0 : i32
    %c0_i32_0 = arith.constant 0 : i32
    %c0_i32_1 = arith.constant 0 : i32
    return %c0_i32, %c0_i32_0 : i32, i32
  }
  func.func @transform_2(%arg0: i32) -> (i32, i32) {
    %c0_i32 = arith.constant 0 : i32
    %c0_i32_0 = arith.constant 0 : i32
    %c0_i32_1 = arith.constant 0 : i32
    return %c0_i32, %c0_i32_0 : i32, i32
  }
  func.func @transform_3(%arg0: i32) -> (i32, i32) {
    %c0_i32 = arith.constant 0 : i32
    %c0_i32_0 = arith.constant 0 : i32
    return %arg0, %c0_i32 : i32, i32
  }
}

module attributes {stable_mosaic.version = 11 : i64} {
  func.func @_conv_stats_kernel(%arg0: i32, %arg1: memref<256x128xf32, #tpu.memory_space<vmem>>, %arg2: memref<128x128xf32, #tpu.memory_space<vmem>>, %arg3: memref<256x128xf32, #tpu.memory_space<vmem>>, %arg4: memref<8x128xf32, #tpu.memory_space<vmem>>) attributes {dimension_semantics = [#tpu.dimension_semantics<parallel>], iteration_bounds = array<i64: 2>, scalar_prefetch = 0 : i64, scratch_operands = 0 : i64, tpu.core_type = #tpu.core_type<tc>, window_params = [{transform_indices = @transform_0, window_bounds = array<i64: 256, 128>}, {pipeline_mode = #tpu.pipeline_mode<synchronous>, transform_indices = @transform_1, window_bounds = array<i64: 128, 128>}, {transform_indices = @transform_2, window_bounds = array<i64: 256, 128>}, {transform_indices = @transform_3, window_bounds = array<i64: 8, 128>}]} {
    %c0 = arith.constant 0 : index
    %c0_0 = arith.constant 0 : index
    %0 = vector.load %arg1[%c0, %c0_0] : memref<256x128xf32, #tpu.memory_space<vmem>>, vector<256x128xf32>
    %c0_1 = arith.constant 0 : index
    %c0_2 = arith.constant 0 : index
    %1 = vector.load %arg2[%c0_1, %c0_2] : memref<128x128xf32, #tpu.memory_space<vmem>>, vector<128x128xf32>
    %cst = arith.constant dense<0.000000e+00> : vector<256x128xf32>
    %2 = tpu.matmul %0, %1, %cst {dimension_numbers = #tpu.dot_dimension_numbers<[1], [0], [0], [1], [0, 0, 1, 1], [], []>} : vector<256x128xf32>, vector<128x128xf32>, vector<256x128xf32> -> vector<256x128xf32>
    %c0_3 = arith.constant 0 : index
    %c0_4 = arith.constant 0 : index
    %3 = vector.load %arg3[%c0_3, %c0_4] : memref<256x128xf32, #tpu.memory_space<vmem>>, vector<256x128xf32>
    tpu.vector_store %arg3[%c0_3, %c0_4], %2 {strides = array<i32>} : memref<256x128xf32, #tpu.memory_space<vmem>>, vector<256x128xf32>,
    %cst_5 = arith.constant dense<0.000000e+00> : vector<128xf32>
    %4 = vector.multi_reduction <add>, %2, %cst_5 [0] : vector<256x128xf32> to vector<128xf32>
    %5 = vector.shape_cast %4 : vector<128xf32> to vector<1x128xf32>
    %6 = arith.mulf %2, %2 : vector<256x128xf32>
    %cst_6 = arith.constant dense<0.000000e+00> : vector<128xf32>
    %7 = vector.multi_reduction <add>, %6, %cst_6 [0] : vector<256x128xf32> to vector<128xf32>
    %8 = vector.shape_cast %7 : vector<128xf32> to vector<1x128xf32>
    %9 = tpu.iota {dimensions = array<i32: 0>} : vector<8x128xi32>
    %c0_i32 = arith.constant 0 : i32
    %10 = vector.broadcast %c0_i32 : i32 to vector<8x128xi32>
    %11 = arith.cmpi eq, %9, %10 : vector<8x128xi32>
    %cst_7 = arith.constant 0.000000e+00 : f32
    %12 = vector.shape_cast %5 : vector<1x128xf32> to vector<1x128xf32>
    %13 = vector.broadcast %12 : vector<1x128xf32> to vector<8x128xf32>
    %14 = vector.broadcast %cst_7 : f32 to vector<8x128xf32>
    %15 = arith.select %11, %13, %14 : vector<8x128xi1>, vector<8x128xf32>
    %c1_i32 = arith.constant 1 : i32
    %16 = vector.broadcast %c1_i32 : i32 to vector<8x128xi32>
    %17 = arith.cmpi eq, %9, %16 : vector<8x128xi32>
    %cst_8 = arith.constant 0.000000e+00 : f32
    %18 = vector.shape_cast %8 : vector<1x128xf32> to vector<1x128xf32>
    %19 = vector.broadcast %18 : vector<1x128xf32> to vector<8x128xf32>
    %20 = vector.broadcast %cst_8 : f32 to vector<8x128xf32>
    %21 = arith.select %17, %19, %20 : vector<8x128xi1>, vector<8x128xf32>
    %22 = arith.addf %15, %21 : vector<8x128xf32>
    %c0_9 = arith.constant 0 : index
    %c0_10 = arith.constant 0 : index
    %23 = vector.load %arg4[%c0_9, %c0_10] : memref<8x128xf32, #tpu.memory_space<vmem>>, vector<8x128xf32>
    tpu.vector_store %arg4[%c0_9, %c0_10], %22 {strides = array<i32>} : memref<8x128xf32, #tpu.memory_space<vmem>>, vector<8x128xf32>,
    return
  }
  func.func @transform_0(%arg0: i32) -> (i32, i32) {
    %c0_i32 = arith.constant 0 : i32
    %c0_i32_0 = arith.constant 0 : i32
    return %arg0, %c0_i32 : i32, i32
  }
  func.func @transform_1(%arg0: i32) -> (i32, i32) {
    %c0_i32 = arith.constant 0 : i32
    %c0_i32_0 = arith.constant 0 : i32
    %c0_i32_1 = arith.constant 0 : i32
    return %c0_i32, %c0_i32_0 : i32, i32
  }
  func.func @transform_2(%arg0: i32) -> (i32, i32) {
    %c0_i32 = arith.constant 0 : i32
    %c0_i32_0 = arith.constant 0 : i32
    return %arg0, %c0_i32 : i32, i32
  }
  func.func @transform_3(%arg0: i32) -> (i32, i32) {
    %c0_i32 = arith.constant 0 : i32
    %c0_i32_0 = arith.constant 0 : i32
    return %arg0, %c0_i32 : i32, i32
  }
}

</mosaic_0001>

<bundles_post_ra>
// kernel: single_conv_forward.3
= control target key start
LH: loop header
LB: loop body
LE: loop exit
PB: predicated region body
PF: predicated region fallthrough
CT: control target
= control target key end

     0   :  { %s511_s12 = smov 0   ;;  %s721_s0 = inlined_call_operand.vmem [shape: f32[512,128], index: 0, kind: input, shape index: {}, may-alias: {0,3}]   ;;  %s722_s1 = inlined_call_operand.vmem [shape: f32[1,128], index: 1, kind: input, shape index: {}]   ;;  %s723_s2 = inlined_call_operand.vmem [shape: f32[1,128], index: 2, kind: input, shape index: {}]   ;;  %s724_s3 = inlined_call_operand.vmem [shape: f32[512,128], index: 3, kind: output, shape index: {}, may-alias: {0,3}]  }
   0x1 LB: > { %s462_s13 = sadd.s32 4294967295, %s489_s12   ;;  %p466_p0 = scmp.ge.s32.totalorder %s489_s12, 1  ;;  %s489_s12 = sphi %s511_s12, %s13_s12  }
   0x2   : > { %p138_p1 = scmp.lt.s32.totalorder %s489_s12, 3 }
   0x4   : > { %p139_p2 = pnand %p466_p0, %p138_p1 }
   0x5   : > { %s467_s14 = sshll.u32 (!%p139_p2), %s462_s13, 5 }
   0x6   : > { %142 = sbr.rel (%p139_p2) target bundleno = 60 (0x3c), region = 32  ;;  %p163_p3 = scmp.lt.s32.totalorder (!%p139_p2), %s467_s14, 63 }
   0xb   : > { %s726_s14 = smov (!%p163_p3, %s467_s14), 63  ;;  %v524_v0 = vld [vmem:[%s722_s1] ss:$0 sm:$0xff] }
   0xc   : > { %s468_s17 = sshll.u32 %s726_s14, 3  ;;  %v537_v1 = vld [vmem:[%s723_s2] ss:$0 sm:$0xff] }
   0xd   : > { %s532_s20 = scalar_lea.vmem %s721_s0, %s468_s17  ;;  %s574_s25 = scalar_lea.vmem %s724_s3, %s468_s17 }
   0xe   : > { %v174_v2 = vld [vmem:[%s532_s20] sm:$0xff]  ;;  %v175_v3 = vld [vmem:[%s532_s20 + $0x8] sm:$0xff]  ;;  %v176_v4 = vld [vmem:[%s532_s20 + $0x10] sm:$0xff] }
   0xf   : > { %v177_v5 = vld [vmem:[%s532_s20 + $0x18] sm:$0xff]  ;;  %v178_v6 = vld [vmem:[%s532_s20 + $0x20] sm:$0xff]  ;;  %v179_v7 = vld [vmem:[%s532_s20 + $0x28] sm:$0xff]  ;;  %v210_v8 = vmul.f32 %v524_v0, %v174_v2  ;;  %v211_v9 = vmul.f32 %v524_v0, %v175_v3  ;;  %v212_v10 = vmul.f32 %v524_v0, %v176_v4 }
  0x10   : > { %v180_v11 = vld [vmem:[%s532_s20 + $0x30] sm:$0xff]  ;;  %v181_v12 = vld [vmem:[%s532_s20 + $0x38] sm:$0xff]  ;;  %v182_v13 = vld [vmem:[%s532_s20 + $0x40] sm:$0xff]  ;;  %v213_v14 = vmul.f32 %v524_v0, %v177_v5  ;;  %v214_v15 = vmul.f32 %v524_v0, %v178_v6  ;;  %v215_v16 = vmul.f32 %v524_v0, %v179_v7 }
  0x11   : > { %v183_v17 = vld [vmem:[%s532_s20 + $0x48] sm:$0xff]  ;;  %v246_v18 = vadd.f32 %v537_v1, %v210_v8  ;;  %v247_v19 = vadd.f32 %v537_v1, %v211_v9  ;;  %v248_v20 = vadd.f32 %v537_v1, %v212_v10  ;;  %v216_v21 = vmul.f32 %v524_v0, %v180_v11  ;;  %v184_v29 = vld [vmem:[%s532_s20 + $0x50] sm:$0xff]  ;;  %v185_v36 = vld [vmem:[%s532_s20 + $0x58] sm:$0xff] }
  0x12   : > { %v249_v22 = vadd.f32 %v537_v1, %v213_v14  ;;  %v250_v23 = vadd.f32 %v537_v1, %v214_v15  ;;  %v251_v24 = vadd.f32 %v537_v1, %v215_v16  ;;  %v217_v25 = vmul.f32 %v524_v0, %v181_v12  ;;  %v186_v37 = vld [vmem:[%s532_s20 + $0x60] sm:$0xff]  ;;  %v187_v38 = vld [vmem:[%s532_s20 + $0x68] sm:$0xff]  ;;  %v188_v39 = vld [vmem:[%s532_s20 + $0x70] sm:$0xff] }
  0x13   : > { %vm278_vm0 = vcmp.ge.f32.partialorder %v246_v18, 0.0  ;;  %v310_v26 = vmul.f32 0.01, %v246_v18  ;;  %v252_v27 = vadd.f32 %v537_v1, %v216_v21  ;;  %v218_v28 = vmul.f32 %v524_v0, %v182_v13  ;;  %v189_v40 = vld [vmem:[%s532_s20 + $0x78] sm:$0xff]  ;;  %v190_v41 = vld [vmem:[%s532_s20 + $0x80] sm:$0xff]  ;;  %v191_v42 = vld [vmem:[%s532_s20 + $0x88] sm:$0xff] }
  0x14   : > { %vm279_vm1 = vcmp.ge.f32.partialorder %v247_v19, 0.0  ;;  %v311_v30 = vmul.f32 0.01, %v247_v19  ;;  %v253_v31 = vadd.f32 %v537_v1, %v217_v25  ;;  %v219_v32 = vmul.f32 %v524_v0, %v183_v17  ;;  %v584_v43 = vld [vmem:[%s532_s20 + $0x90] sm:$0xff]  ;;  %v587_v44 = vld [vmem:[%s532_s20 + $0x98] sm:$0xff]  ;;  %v590_v45 = vld [vmem:[%s532_s20 + $0xa0] sm:$0xff] }
  0x15   : > { %v342_v33 = vsel %vm278_vm0, %v246_v18, %v310_v26  ;;  %vm280_vm2 = vcmp.ge.f32.partialorder %v248_v20, 0.0  ;;  %v312_v34 = vmul.f32 0.01, %v248_v20  ;;  %v254_v35 = vadd.f32 %v537_v1, %v218_v28  ;;  %v593_v46 = vld [vmem:[%s532_s20 + $0xa8] sm:$0xff]  ;;  %v596_v47 = vld [vmem:[%s532_s20 + $0xb0] sm:$0xff]  ;;  %v599_v48 = vld [vmem:[%s532_s20 + $0xb8] sm:$0xff] }
  0x16   : > { %v602_v49 = vld [vmem:[%s532_s20 + $0xc0] sm:$0xff]  ;;  %v605_v50 = vld [vmem:[%s532_s20 + $0xc8] sm:$0xff]  ;;  %v608_v51 = vld [vmem:[%s532_s20 + $0xd0] sm:$0xff]  ;;  %v343_v52 = vsel %vm279_vm1, %v247_v19, %v311_v30  ;;  %vm281_vm3 = vcmp.ge.f32.partialorder %v249_v22, 0.0  ;;  %v313_v53 = vmul.f32 0.01, %v249_v22  ;;  %v255_v54 = vadd.f32 %v537_v1, %v219_v32 }
  0x17   : > { %v613_v55 = vld [vmem:[%s532_s20 + $0xd8] sm:$0xff]  ;;  %v616_v56 = vld [vmem:[%s532_s20 + $0xe0] sm:$0xff]  ;;  %v619_v57 = vld [vmem:[%s532_s20 + $0xe8] sm:$0xff]  ;;  %v344_v58 = vsel %vm280_vm2, %v248_v20, %v312_v34  ;;  %vm282_vm4 = vcmp.ge.f32.partialorder %v250_v23, 0.0  ;;  %v314_v59 = vmul.f32 0.01, %v250_v23  ;;  %v220_v60 = vmul.f32 %v524_v0, %v184_v29 }
  0x18   : > { %v624_v61 = vld [vmem:[%s532_s20 + $0xf0] sm:$0xff]  ;;  %v627_v62 = vld [vmem:[%s532_s20 + $0xf8] sm:$0xff]  ;;  %v345_v63 = vsel %vm281_vm3, %v249_v22, %v313_v53  ;;  %vm283_vm5 = vcmp.ge.f32.partialorder %v251_v24, 0.0  ;;  %v315_v2 = vmul.f32 0.01, %v251_v24  ;;  %vm284_vm6 = vcmp.ge.f32.partialorder %v252_v27, 0.0 }
  0x19   : > { %374 = vst [vmem:[%s574_s25] sm:$0xff] %v342_v33  ;;  %v346_v3 = vsel %vm282_vm4, %v250_v23, %v314_v59  ;;  %v316_v4 = vmul.f32 0.01, %v252_v27  ;;  %vm285_vm7 = vcmp.ge.f32.partialorder %v253_v31, 0.0  ;;  %v317_v5 = vmul.f32 0.01, %v253_v31 }
  0x1a   : > { %375 = vst [vmem:[%s574_s25 + $0x8] sm:$0xff] %v343_v52  ;;  %v347_v6 = vsel %vm283_vm5, %v251_v24, %v315_v2  ;;  %vm286_vm8 = vcmp.ge.f32.partialorder %v254_v35, 0.0  ;;  %v318_v7 = vmul.f32 0.01, %v254_v35  ;;  %vm287_vm9 = vcmp.ge.f32.partialorder %v255_v54, 0.0 }
  0x1b   : > { %376 = vst [vmem:[%s574_s25 + $0x10] sm:$0xff] %v344_v58  ;;  %v348_v8 = vsel %vm284_vm6, %v252_v27, %v316_v4  ;;  %v349_v9 = vsel %vm285_vm7, %v253_v31, %v317_v5  ;;  %v319_v10 = vmul.f32 0.01, %v255_v54  ;;  %v256_v11 = vadd.f32 %v537_v1, %v220_v60 }
  0x1c   : > { %377 = vst [vmem:[%s574_s25 + $0x18] sm:$0xff] %v345_v63  ;;  %v350_v12 = vsel %vm286_vm8, %v254_v35, %v318_v7  ;;  %v221_v13 = vmul.f32 %v524_v0, %v185_v36  ;;  %v222_v14 = vmul.f32 %v524_v0, %v186_v37  ;;  %v223_v15 = vmul.f32 %v524_v0, %v187_v38 }
  0x1d   : > { %378 = vst [vmem:[%s574_s25 + $0x20] sm:$0xff] %v346_v3  ;;  %v351_v16 = vsel %vm287_vm9, %v255_v54, %v319_v10  ;;  %vm288_vm10 = vcmp.ge.f32.partialorder %v256_v11, 0.0  ;;  %v320_v17 = vmul.f32 0.01, %v256_v11  ;;  %v224_v18 = vmul.f32 %v524_v0, %v188_v39 }
  0x1e   : > { %379 = vst [vmem:[%s574_s25 + $0x28] sm:$0xff] %v347_v6  ;;  %v257_v19 = vadd.f32 %v537_v1, %v221_v13  ;;  %v258_v20 = vadd.f32 %v537_v1, %v222_v14  ;;  %v259_v21 = vadd.f32 %v537_v1, %v223_v15  ;;  %v225_v22 = vmul.f32 %v524_v0, %v189_v40 }
  0x1f   : > { %380 = vst [vmem:[%s574_s25 + $0x30] sm:$0xff] %v348_v8  ;;  %v352_v23 = vsel %vm288_vm10, %v256_v11, %v320_v17  ;;  %v260_v24 = vadd.f32 %v537_v1, %v224_v18  ;;  %v226_v25 = vmul.f32 %v524_v0, %v190_v41  ;;  %v227_v26 = vmul.f32 %v524_v0, %v191_v42 }
  0x20   : > { %381 = vst [vmem:[%s574_s25 + $0x38] sm:$0xff] %v349_v9  ;;  %vm289_vm11 = vcmp.ge.f32.partialorder %v257_v19, 0.0  ;;  %v321_v27 = vmul.f32 0.01, %v257_v19  ;;  %vm290_vm12 = vcmp.ge.f32.partialorder %v258_v20, 0.0  ;;  %vm291_vm13 = vcmp.ge.f32.partialorder %v259_v21, 0.0 }
  0x21   : > { %382 = vst [vmem:[%s574_s25 + $0x40] sm:$0xff] %v350_v12  ;;  %v322_v28 = vmul.f32 0.01, %v258_v20  ;;  %v323_v29 = vmul.f32 0.01, %v259_v21  ;;  %vm292_vm14 = vcmp.ge.f32.partialorder %v260_v24, 0.0  ;;  %v261_v30 = vadd.f32 %v537_v1, %v225_v22 }
  0x22   : > { %383 = vst [vmem:[%s574_s25 + $0x48] sm:$0xff] %v351_v16  ;;  %v353_v31 = vsel %vm289_vm11, %v257_v19, %v321_v27  ;;  %v324_v32 = vmul.f32 0.01, %v260_v24  ;;  %v262_v33 = vadd.f32 %v537_v1, %v226_v25  ;;  %v263_v34 = vadd.f32 %v537_v1, %v227_v26 }
  0x23   : > { %384 = vst [vmem:[%s574_s25 + $0x50] sm:$0xff] %v352_v23  ;;  %v354_v35 = vsel %vm290_vm12, %v258_v20, %v322_v28  ;;  %v355_v36 = vsel %vm291_vm13, %v259_v21, %v323_v29  ;;  %vm293_vm15 = vcmp.ge.f32.partialorder %v261_v30, 0.0  ;;  %v325_v37 = vmul.f32 0.01, %v261_v30 }
  0x24   : > { %385 = vst [vmem:[%s574_s25 + $0x58] sm:$0xff] %v353_v31  ;;  %v356_v38 = vsel %vm292_vm14, %v260_v24, %v324_v32  ;;  %vm294_vm0 = vcmp.ge.f32.partialorder %v262_v33, 0.0  ;;  %v326_v39 = vmul.f32 0.01, %v262_v33  ;;  %vm295_vm1 = vcmp.ge.f32.partialorder %v263_v34, 0.0 }
  0x25   : > { %386 = vst [vmem:[%s574_s25 + $0x60] sm:$0xff] %v354_v35  ;;  %v357_v40 = vsel %vm293_vm15, %v261_v30, %v325_v37  ;;  %v327_v41 = vmul.f32 0.01, %v263_v34  ;;  %v228_v42 = vmul.f32 %v524_v0, %v584_v43  ;;  %v229_v52 = vmul.f32 %v524_v0, %v587_v44 }
  0x26   : > { %387 = vst [vmem:[%s574_s25 + $0x68] sm:$0xff] %v355_v36  ;;  %v358_v53 = vsel %vm294_vm0, %v262_v33, %v326_v39  ;;  %v230_v54 = vmul.f32 %v524_v0, %v590_v45  ;;  %v231_v58 = vmul.f32 %v524_v0, %v593_v46  ;;  %v232_v59 = vmul.f32 %v524_v0, %v596_v47 }
  0x27   : > { %388 = vst [vmem:[%s574_s25 + $0x70] sm:$0xff] %v356_v38  ;;  %v359_v60 = vsel %vm295_vm1, %v263_v34, %v327_v41  ;;  %v264_v43 = vadd.f32 %v537_v1, %v228_v42  ;;  %v265_v63 = vadd.f32 %v537_v1, %v229_v52  ;;  %v233_v44 = vmul.f32 %v524_v0, %v599_v48 }
  0x28   : > { %389 = vst [vmem:[%s574_s25 + $0x78] sm:$0xff] %v357_v40  ;;  %v266_v2 = vadd.f32 %v537_v1, %v230_v54  ;;  %v267_v45 = vadd.f32 %v537_v1, %v231_v58  ;;  %v268_v46 = vadd.f32 %v537_v1, %v232_v59  ;;  %v234_v47 = vmul.f32 %v524_v0, %v602_v49 }
  0x29   : > { %390 = vst [vmem:[%s574_s25 + $0x80] sm:$0xff] %v358_v53  ;;  %vm296_vm2 = vcmp.ge.f32.partialorder %v264_v43, 0.0  ;;  %v328_v3 = vmul.f32 0.01, %v264_v43  ;;  %vm297_vm3 = vcmp.ge.f32.partialorder %v265_v63, 0.0  ;;  %v269_v4 = vadd.f32 %v537_v1, %v233_v44 }
  0x2a   : > { %391 = vst [vmem:[%s574_s25 + $0x88] sm:$0xff] %v359_v60  ;;  %v329_v48 = vmul.f32 0.01, %v265_v63  ;;  %vm298_vm4 = vcmp.ge.f32.partialorder %v266_v2, 0.0  ;;  %v330_v5 = vmul.f32 0.01, %v266_v2  ;;  %v270_v6 = vadd.f32 %v537_v1, %v234_v47 }
  0x2b   : > { %v360_v7 = vsel %vm296_vm2, %v264_v43, %v328_v3  ;;  %vm299_vm5 = vcmp.ge.f32.partialorder %v267_v45, 0.0  ;;  %v331_v8 = vmul.f32 0.01, %v267_v45  ;;  %vm300_vm6 = vcmp.ge.f32.partialorder %v268_v46, 0.0 }
  0x2c   : > { %392 = vst [vmem:[%s574_s25 + $0x90] sm:$0xff] %v360_v7  ;;  %v361_v49 = vsel %vm297_vm3, %v265_v63, %v329_v48  ;;  %v362_v9 = vsel %vm298_vm4, %v266_v2, %v330_v5  ;;  %v332_v10 = vmul.f32 0.01, %v268_v46  ;;  %vm301_vm7 = vcmp.ge.f32.partialorder %v269_v4, 0.0 }
  0x2d   : > { %393 = vst [vmem:[%s574_s25 + $0x98] sm:$0xff] %v361_v49  ;;  %v363_v11 = vsel %vm299_vm5, %v267_v45, %v331_v8  ;;  %v333_v12 = vmul.f32 0.01, %v269_v4  ;;  %vm302_vm8 = vcmp.ge.f32.partialorder %v270_v6, 0.0  ;;  %v334_v13 = vmul.f32 0.01, %v270_v6 }
  0x2e   : > { %394 = vst [vmem:[%s574_s25 + $0xa0] sm:$0xff] %v362_v9  ;;  %v364_v14 = vsel %vm300_vm6, %v268_v46, %v332_v10  ;;  %v235_v15 = vmul.f32 %v524_v0, %v605_v50  ;;  %v236_v16 = vmul.f32 %v524_v0, %v608_v51  ;;  %v237_v17 = vmul.f32 %v524_v0, %v613_v55 }
  0x2f   : > { %395 = vst [vmem:[%s574_s25 + $0xa8] sm:$0xff] %v363_v11  ;;  %v365_v18 = vsel %vm301_vm7, %v269_v4, %v333_v12  ;;  %v366_v19 = vsel %vm302_vm8, %v270_v6, %v334_v13  ;;  %v238_v20 = vmul.f32 %v524_v0, %v616_v56  ;;  %v239_v21 = vmul.f32 %v524_v0, %v619_v57 }
  0x30   : > { %396 = vst [vmem:[%s574_s25 + $0xb0] sm:$0xff] %v364_v14  ;;  %v271_v22 = vadd.f32 %v537_v1, %v235_v15  ;;  %v272_v50 = vadd.f32 %v537_v1, %v236_v16  ;;  %v273_v51 = vadd.f32 %v537_v1, %v237_v17  ;;  %v240_v23 = vmul.f32 %v524_v0, %v624_v61 }
  0x31   : > { %397 = vst [vmem:[%s574_s25 + $0xb8] sm:$0xff] %v365_v18  ;;  %v274_v55 = vadd.f32 %v537_v1, %v238_v20  ;;  %v275_v24 = vadd.f32 %v537_v1, %v239_v21  ;;  %v241_v56 = vmul.f32 %v524_v0, %v627_v62 }
  0x32   : > { %398 = vst [vmem:[%s574_s25 + $0xc0] sm:$0xff] %v366_v19  ;;  %vm303_vm9 = vcmp.ge.f32.partialorder %v271_v22, 0.0  ;;  %v335_v57 = vmul.f32 0.01, %v271_v22  ;;  %vm304_vm10 = vcmp.ge.f32.partialorder %v272_v50, 0.0  ;;  %vm305_vm11 = vcmp.ge.f32.partialorder %v273_v51, 0.0 }
  0x33   : > { %v336_v25 = vmul.f32 0.01, %v272_v50  ;;  %v337_v26 = vmul.f32 0.01, %v273_v51  ;;  %vm306_vm12 = vcmp.ge.f32.partialorder %v274_v55, 0.0  ;;  %vm307_vm13 = vcmp.ge.f32.partialorder %v275_v24, 0.0 }
  0x34   : > { %v367_v61 = vsel %vm303_vm9, %v271_v22, %v335_v57  ;;  %v338_v27 = vmul.f32 0.01, %v274_v55  ;;  %v339_v28 = vmul.f32 0.01, %v275_v24  ;;  %v276_v29 = vadd.f32 %v537_v1, %v240_v23 }
  0x35   : > { %399 = vst [vmem:[%s574_s25 + $0xc8] sm:$0xff] %v367_v61  ;;  %v368_v0 = vsel %vm304_vm10, %v272_v50, %v336_v25  ;;  %v369_v62 = vsel %vm305_vm11, %v273_v51, %v337_v26  ;;  %v277_v30 = vadd.f32 %v537_v1, %v241_v56 }
  0x36   : > { %400 = vst [vmem:[%s574_s25 + $0xd0] sm:$0xff] %v368_v0  ;;  %v370_v31 = vsel %vm306_vm12, %v274_v55, %v338_v27  ;;  %v371_v32 = vsel %vm307_vm13, %v275_v24, %v339_v28  ;;  %vm308_vm14 = vcmp.ge.f32.partialorder %v276_v29, 0.0  ;;  %v340_v33 = vmul.f32 0.01, %v276_v29 }
  0x37   : > { %401 = vst [vmem:[%s574_s25 + $0xd8] sm:$0xff] %v369_v62  ;;  %vm309_vm15 = vcmp.ge.f32.partialorder %v277_v30, 0.0  ;;  %v341_v34 = vmul.f32 0.01, %v277_v30 }
  0x38   : > { %402 = vst [vmem:[%s574_s25 + $0xe0] sm:$0xff] %v370_v31  ;;  %v372_v35 = vsel %vm308_vm14, %v276_v29, %v340_v33 }
  0x39   : > { %403 = vst [vmem:[%s574_s25 + $0xe8] sm:$0xff] %v371_v32  ;;  %v373_v36 = vsel %vm309_vm15, %v277_v30, %v341_v34 }
  0x3a   : > { %404 = vst [vmem:[%s574_s25 + $0xf0] sm:$0xff] %v372_v35 }
  0x3b   : > { %405 = vst [vmem:[%s574_s25 + $0xf8] sm:$0xff] %v373_v36 }
  0x3c PF: > { %s13_s12 = sadd.s32 1, %s489_s12  }
  0x3d   : > { %p10_p4 = scmp.ge.s32.totalorder %s13_s12, 4  }
  0x3f   :  { %12 = sbr.rel (!%p10_p4) target bundleno = 1 (0x1), region = 62 }

// kernel: single_conv_forward.2
= control target key start
LH: loop header
LB: loop body
LE: loop exit
PB: predicated region body
PF: predicated region fallthrough
CT: control target
= control target key end

     0   :  { %s675_s12 = smov 0   ;;  %s931_s0 = inlined_call_operand.vmem [shape: f32[512,128], index: 0, kind: input, shape index: {}]   ;;  %s932_s1 = inlined_call_operand.vmem [shape: f32[128,128], index: 1, kind: input, shape index: {}]   ;;  %s933_s2 = inlined_call_operand.vmem [shape: f32[512,128], index: 2, kind: output, shape index: {0}]   ;;  %s934_s3 = inlined_call_operand.vmem [shape: f32[16,128], index: 3, kind: output, shape index: {1}]  }
   0x1 LB: > { %s681_s13 = sadd.s32 4294967295, %s653_s12   ;;  %p583_p0 = scmp.ge.s32.totalorder %s653_s12, 1  ;;  %s653_s12 = sphi %s675_s12, %s14_s12  }
   0x2   : > { %p141_p1 = scmp.lt.s32.totalorder %s653_s12, 3 }
   0x4   : > { %p142_p2 = pnand %p583_p0, %p141_p1 }
   0x5   : > { %s584_s30 = sshll.u32 (!%p142_p2), %s681_s13, 5  ;;  %p181_p4 = scmp.lt.s32.totalorder (!%p142_p2), %s681_s13, 1 }
   0x6   : > { %145 = sbr.rel (%p142_p2) target bundleno = 293 (0x125), region = 28  ;;  %p170_p3 = scmp.lt.s32.totalorder (!%p142_p2), %s584_s30, 63 }
   0xb   : > { %v232_v0 = vld [vmem:[%s932_s1 + $0x78] sm:$0xff]  ;;  %v231_v1 = vld [vmem:[%s932_s1 + $0x70] sm:$0xff]  ;;  %v230_v2 = vld [vmem:[%s932_s1 + $0x68] sm:$0xff]  ;;  %s936_s30 = smov (!%p170_p3, %s584_s30), 63  ;;  %s938_s13 = smov (!%p181_p4, %s681_s13), 1 }
   0xc   : > { %233 = vmatpush.msra.mxu0 %v232_v0  ;;  %591 = vmatpush.msra.mxu1 %v232_v0  ;;  %v229_v3 = vld [vmem:[%s932_s1 + $0x60] sm:$0xff]  ;;  %v228_v4 = vld [vmem:[%s932_s1 + $0x58] sm:$0xff]  ;;  %v227_v5 = vld [vmem:[%s932_s1 + $0x50] sm:$0xff]  ;;  %s585_s16 = sshll.u32 %s936_s30, 3  ;;  %s588_s29 = sshll.u32 %s938_s13, 3 }
   0xd   : > { %592 = vmatpush.msra.mxu2 %v232_v0  ;;  %593 = vmatpush.msra.mxu3 %v232_v0  ;;  %v226_v6 = vld [vmem:[%s932_s1 + $0x48] sm:$0xff]  ;;  %v225_v7 = vld [vmem:[%s932_s1 + $0x40] sm:$0xff]  ;;  %v224_v8 = vld [vmem:[%s932_s1 + $0x38] sm:$0xff]  ;;  %s739_s23 = scalar_lea.vmem %s931_s0, %s585_s16  ;;  %s781_s28 = scalar_lea.vmem %s933_s2, %s585_s16 }
   0xe   : > { %234 = vmatpush.msra.mxu0 %v231_v1  ;;  %594 = vmatpush.msra.mxu1 %v231_v1  ;;  %v223_v9 = vld [vmem:[%s932_s1 + $0x30] sm:$0xff]  ;;  %v222_v10 = vld [vmem:[%s932_s1 + $0x28] sm:$0xff]  ;;  %v221_v11 = vld [vmem:[%s932_s1 + $0x20] sm:$0xff]  ;;  %s184_s5 = scalar_lea.vmem %s934_s3, %s588_s29 }
   0xf   : > { %595 = vmatpush.msra.mxu2 %v231_v1  ;;  %596 = vmatpush.msra.mxu3 %v231_v1  ;;  %v220_v12 = vld [vmem:[%s932_s1 + $0x18] sm:$0xff]  ;;  %v219_v13 = vld [vmem:[%s932_s1 + $0x10] sm:$0xff]  ;;  %v218_v14 = vld [vmem:[%s932_s1 + $0x8] sm:$0xff] }
  0x10   : > { %235 = vmatpush.msra.mxu0 %v230_v2  ;;  %597 = vmatpush.msra.mxu1 %v230_v2  ;;  %v217_v15 = vld [vmem:[%s932_s1] sm:$0xff]  ;;  %v186_v19 = vld [vmem:[%s739_s23 + $0x8] sm:$0xff]  ;;  %v187_v23 = vld [vmem:[%s739_s23 + $0x10] sm:$0xff] }
  0x11   : > { %598 = vmatpush.msra.mxu2 %v230_v2  ;;  %599 = vmatpush.msra.mxu3 %v230_v2  ;;  %v185_v16 = vld [vmem:[%s739_s23] sm:$0xff]  ;;  %v194_v20 = vld [vmem:[%s739_s23 + $0x48] sm:$0xff]  ;;  %v195_v24 = vld [vmem:[%s739_s23 + $0x50] sm:$0xff] }
  0x12   : > { %236 = vmatpush.msra.mxu0 %v229_v3  ;;  %600 = vmatpush.msra.mxu1 %v229_v3  ;;  %v193_v17 = vld [vmem:[%s739_s23 + $0x40] sm:$0xff]  ;;  %v202_v21 = vld [vmem:[%s739_s23 + $0x88] sm:$0xff]  ;;  %v203_v25 = vld [vmem:[%s739_s23 + $0x90] sm:$0xff] }
  0x13   : > { %601 = vmatpush.msra.mxu2 %v229_v3  ;;  %602 = vmatpush.msra.mxu3 %v229_v3  ;;  %v201_v18 = vld [vmem:[%s739_s23 + $0x80] sm:$0xff]  ;;  %v210_v26 = vld [vmem:[%s739_s23 + $0xc8] sm:$0xff]  ;;  %v188_v27 = vld [vmem:[%s739_s23 + $0x18] sm:$0xff] }
  0x14   : > { %237 = vmatpush.msra.mxu0 %v228_v4  ;;  %603 = vmatpush.msra.mxu1 %v228_v4  ;;  %v209_v22 = vld [vmem:[%s739_s23 + $0xc0] sm:$0xff]  ;;  %v196_v28 = vld [vmem:[%s739_s23 + $0x58] sm:$0xff]  ;;  %v211_v30 = vld [vmem:[%s739_s23 + $0xd0] sm:$0xff] }
  0x15   : > { %604 = vmatpush.msra.mxu2 %v228_v4  ;;  %605 = vmatpush.msra.mxu3 %v228_v4  ;;  %v204_v29 = vld [vmem:[%s739_s23 + $0x98] sm:$0xff]  ;;  %v189_v31 = vld [vmem:[%s739_s23 + $0x20] sm:$0xff]  ;;  %v190_v35 = vld [vmem:[%s739_s23 + $0x28] sm:$0xff] }
  0x16   : > { %238 = vmatpush.msra.mxu0 %v227_v5  ;;  %606 = vmatpush.msra.mxu1 %v227_v5  ;;  %v197_v32 = vld [vmem:[%s739_s23 + $0x60] sm:$0xff]  ;;  %v212_v33 = vld [vmem:[%s739_s23 + $0xd8] sm:$0xff]  ;;  %v198_v36 = vld [vmem:[%s739_s23 + $0x68] sm:$0xff] }
  0x17   : > { %607 = vmatpush.msra.mxu2 %v227_v5  ;;  %608 = vmatpush.msra.mxu3 %v227_v5  ;;  %v205_v34 = vld [vmem:[%s739_s23 + $0xa0] sm:$0xff]  ;;  %v206_v38 = vld [vmem:[%s739_s23 + $0xa8] sm:$0xff]  ;;  %v191_v39 = vld [vmem:[%s739_s23 + $0x30] sm:$0xff] }
  0x18   : > { %239 = vmatpush.msra.mxu0 %v226_v6  ;;  %609 = vmatpush.msra.mxu1 %v226_v6  ;;  %v213_v37 = vld [vmem:[%s739_s23 + $0xe0] sm:$0xff]  ;;  %v199_v40 = vld [vmem:[%s739_s23 + $0x70] sm:$0xff]  ;;  %v214_v41 = vld [vmem:[%s739_s23 + $0xe8] sm:$0xff] }
  0x19   : > { %610 = vmatpush.msra.mxu2 %v226_v6  ;;  %611 = vmatpush.msra.mxu3 %v226_v6  ;;  %v207_v42 = vld [vmem:[%s739_s23 + $0xb0] sm:$0xff]  ;;  %v192_v43 = vld [vmem:[%s739_s23 + $0x38] sm:$0xff] }
  0x1a   : > { %240 = vmatpush.msra.mxu0 %v225_v7  ;;  %612 = vmatpush.msra.mxu1 %v225_v7  ;;  %v200_v44 = vld [vmem:[%s739_s23 + $0x78] sm:$0xff]  ;;  %v215_v45 = vld [vmem:[%s739_s23 + $0xf0] sm:$0xff] }
  0x1b   : > { %613 = vmatpush.msra.mxu2 %v225_v7  ;;  %614 = vmatpush.msra.mxu3 %v225_v7  ;;  %v208_v46 = vld [vmem:[%s739_s23 + $0xb8] sm:$0xff] }
  0x1c   : > { %241 = vmatpush.msra.mxu0 %v224_v8  ;;  %615 = vmatpush.msra.mxu1 %v224_v8  ;;  %v216_v47 = vld [vmem:[%s739_s23 + $0xf8] sm:$0xff] }
  0x1d   : > { %616 = vmatpush.msra.mxu2 %v224_v8  ;;  %617 = vmatpush.msra.mxu3 %v224_v8 }
  0x1e   : > { %242 = vmatpush.msra.mxu0 %v223_v9  ;;  %618 = vmatpush.msra.mxu1 %v223_v9 }
  0x1f   : > { %619 = vmatpush.msra.mxu2 %v223_v9  ;;  %620 = vmatpush.msra.mxu3 %v223_v9 }
  0x20   : > { %243 = vmatpush.msra.mxu0 %v222_v10  ;;  %621 = vmatpush.msra.mxu1 %v222_v10 }
  0x21   : > { %622 = vmatpush.msra.mxu2 %v222_v10  ;;  %623 = vmatpush.msra.mxu3 %v222_v10 }
  0x22   : > { %244 = vmatpush.msra.mxu0 %v221_v11  ;;  %624 = vmatpush.msra.mxu1 %v221_v11 }
  0x23   : > { %625 = vmatpush.msra.mxu2 %v221_v11  ;;  %626 = vmatpush.msra.mxu3 %v221_v11 }
  0x24   : > { %245 = vmatpush.msra.mxu0 %v220_v12  ;;  %627 = vmatpush.msra.mxu1 %v220_v12 }
  0x25   : > { %628 = vmatpush.msra.mxu2 %v220_v12  ;;  %629 = vmatpush.msra.mxu3 %v220_v12 }
  0x26   : > { %246 = vmatpush.msra.mxu0 %v219_v13  ;;  %630 = vmatpush.msra.mxu1 %v219_v13 }
  0x27   : > { %631 = vmatpush.msra.mxu2 %v219_v13  ;;  %632 = vmatpush.msra.mxu3 %v219_v13 }
  0x28   : > { %247 = vmatpush.msra.mxu0 %v218_v14  ;;  %633 = vmatpush.msra.mxu1 %v218_v14 }
  0x29   : > { %634 = vmatpush.msra.mxu2 %v218_v14  ;;  %635 = vmatpush.msra.mxu3 %v218_v14 }
  0x2a   : > { %248 = vmatpush.msra.mxu0 %v217_v15  ;;  %636 = vmatpush.msra.mxu1 %v217_v15 }
  0x2b   : > { %249 = vmatmul.f32.vlgmr.msra.gmra.mxu0 %v185_v16  ;;  %273 = vmatmul.f32.vlgmr.msra.gmra.mxu1 %v193_v17 }
  0x2c   : > { %637 = vmatpush.msra.mxu2 %v217_v15  ;;  %638 = vmatpush.msra.mxu3 %v217_v15 }
  0x2d   : > { %297 = vmatmul.f32.vlgmr.msra.gmra.mxu2 %v201_v18  ;;  %321 = vmatmul.f32.vlgmr.msra.gmra.mxu3 %v209_v22 }
  0x33   : > { %252 = vmatmul.f32.gmra.mxu0 %v186_v19  ;;  %276 = vmatmul.f32.gmra.mxu1 %v194_v20 }
  0x35   : > { %300 = vmatmul.f32.gmra.mxu2 %v202_v21  ;;  %324 = vmatmul.f32.gmra.mxu3 %v210_v26 }
  0x3b   : > { %255 = vmatmul.f32.gmra.mxu0 %v187_v23  ;;  %279 = vmatmul.f32.gmra.mxu1 %v195_v24 }
  0x3d   : > { %303 = vmatmul.f32.gmra.mxu2 %v203_v25  ;;  %327 = vmatmul.f32.gmra.mxu3 %v211_v30 }
  0x43   : > { %258 = vmatmul.f32.gmra.mxu0 %v188_v27  ;;  %282 = vmatmul.f32.gmra.mxu1 %v196_v28 }
  0x45   : > { %306 = vmatmul.f32.gmra.mxu2 %v204_v29  ;;  %330 = vmatmul.f32.gmra.mxu3 %v212_v33 }
  0x4b   : > { %261 = vmatmul.f32.gmra.mxu0 %v189_v31  ;;  %285 = vmatmul.f32.gmra.mxu1 %v197_v32 }
  0x4d   : > { %309 = vmatmul.f32.gmra.mxu2 %v205_v34  ;;  %333 = vmatmul.f32.gmra.mxu3 %v213_v37 }
  0x53   : > { %264 = vmatmul.f32.gmra.mxu0 %v190_v35  ;;  %288 = vmatmul.f32.gmra.mxu1 %v198_v36 }
  0x55   : > { %312 = vmatmul.f32.gmra.mxu2 %v206_v38  ;;  %336 = vmatmul.f32.gmra.mxu3 %v214_v41 }
  0x5b   : > { %267 = vmatmul.f32.gmra.mxu0 %v191_v39  ;;  %291 = vmatmul.f32.gmra.mxu1 %v199_v40 }
  0x5d   : > { %315 = vmatmul.f32.gmra.mxu2 %v207_v42  ;;  %339 = vmatmul.f32.gmra.mxu3 %v215_v45 }
  0x63   : > { %270 = vmatmul.f32.gmra.mxu0 %v192_v43  ;;  %294 = vmatmul.f32.gmra.mxu1 %v200_v44 }
  0x65   : > { %318 = vmatmul.f32.gmra.mxu2 %v208_v46  ;;  %342 = vmatmul.f32.gmra.mxu3 %v216_v47 }
  0xa8   : > { %v250_v48 = vpop.f32.mrf.mxu0  ;;  %v783_v49 = vpop.f32.mrf.mxu1 }
  0xa9   : > { %346 = vst [vmem:[%s781_s28] sm:$0xff] %v250_v48  ;;  %v415_v6 = vmul.f32 %v250_v48, %v250_v48  ;;  %v423_v34 = vmul.f32 %v783_v49, %v783_v49 }
  0xaa   : > { %354 = vst [vmem:[%s781_s28 + $0x40] sm:$0xff] %v783_v49 }
  0xb0   : > { %v253_v50 = vpop.f32.mrf.mxu0  ;;  %v788_v51 = vpop.f32.mrf.mxu1 }
  0xb1   : > { %347 = vst [vmem:[%s781_s28 + $0x8] sm:$0xff] %v253_v50  ;;  %v791_v52 = vpop.f32.mrf.mxu2  ;;  %v802_v56 = vpop.f32.mrf.mxu3  ;;  %v416_v5 = vmul.f32 %v253_v50, %v253_v50  ;;  %v378_v7 = vadd.f32 %v253_v50, %v250_v48  ;;  %v424_v37 = vmul.f32 %v788_v51, %v788_v51 }
  0xb2   : > { %355 = vst [vmem:[%s781_s28 + $0x48] sm:$0xff] %v788_v51 }
  0xb3   : > { %362 = vst [vmem:[%s781_s28 + $0x80] sm:$0xff] %v791_v52  ;;  %v447_v9 = vadd.f32 %v416_v5, %v415_v6 }
  0xb4   : > { %370 = vst [vmem:[%s781_s28 + $0xc0] sm:$0xff] %v802_v56 }
  0xb8   : > { %v256_v53 = vpop.f32.mrf.mxu0  ;;  %v797_v54 = vpop.f32.mrf.mxu1 }
  0xb9   : > { %348 = vst [vmem:[%s781_s28 + $0x10] sm:$0xff] %v256_v53  ;;  %v800_v55 = vpop.f32.mrf.mxu2  ;;  %v815_v60 = vpop.f32.mrf.mxu3  ;;  %v417_v8 = vmul.f32 %v256_v53, %v256_v53  ;;  %v379_v10 = vadd.f32 %v378_v7, %v256_v53  ;;  %v425_v40 = vmul.f32 %v797_v54, %v797_v54 }
  0xba   : > { %356 = vst [vmem:[%s781_s28 + $0x50] sm:$0xff] %v797_v54 }
  0xbb   : > { %363 = vst [vmem:[%s781_s28 + $0x88] sm:$0xff] %v800_v55  ;;  %v448_v14 = vadd.f32 %v447_v9, %v417_v8  ;;  %v431_v8 = vmul.f32 %v791_v52, %v791_v52 }
  0xbc   : > { %371 = vst [vmem:[%s781_s28 + $0xc8] sm:$0xff] %v815_v60 }
  0xc0   : > { %v259_v57 = vpop.f32.mrf.mxu0  ;;  %v810_v58 = vpop.f32.mrf.mxu1 }
  0xc1   : > { %349 = vst [vmem:[%s781_s28 + $0x18] sm:$0xff] %v259_v57  ;;  %v813_v59 = vpop.f32.mrf.mxu2  ;;  %v828_v0 = vpop.f32.mrf.mxu3  ;;  %v418_v11 = vmul.f32 %v259_v57, %v259_v57  ;;  %v380_v15 = vadd.f32 %v379_v10, %v259_v57  ;;  %v426_v43 = vmul.f32 %v810_v58, %v810_v58  ;;  %v432_v10 = vmul.f32 %v800_v55, %v800_v55 }
  0xc2   : > { %357 = vst [vmem:[%s781_s28 + $0x58] sm:$0xff] %v810_v58 }
  0xc3   : > { %364 = vst [vmem:[%s781_s28 + $0x90] sm:$0xff] %v813_v59  ;;  %v449_v19 = vadd.f32 %v448_v14, %v418_v11 }
  0xc4   : > { %372 = vst [vmem:[%s781_s28 + $0xd0] sm:$0xff] %v828_v0 }
  0xc8   : > { %v262_v61 = vpop.f32.mrf.mxu0  ;;  %v823_v62 = vpop.f32.mrf.mxu1 }
  0xc9   : > { %350 = vst [vmem:[%s781_s28 + $0x20] sm:$0xff] %v262_v61  ;;  %v826_v63 = vpop.f32.mrf.mxu2  ;;  %v841_v4 = vpop.f32.mrf.mxu3  ;;  %v419_v16 = vmul.f32 %v262_v61, %v262_v61  ;;  %v381_v20 = vadd.f32 %v380_v15, %v262_v61  ;;  %v427_v48 = vmul.f32 %v823_v62, %v823_v62 }
  0xca   : > { %358 = vst [vmem:[%s781_s28 + $0x60] sm:$0xff] %v823_v62  ;;  %v434_v15 = vmul.f32 %v826_v63, %v826_v63 }
  0xcb   : > { %365 = vst [vmem:[%s781_s28 + $0x98] sm:$0xff] %v826_v63  ;;  %v450_v22 = vadd.f32 %v449_v19, %v419_v16 }
  0xcc   : > { %373 = vst [vmem:[%s781_s28 + $0xd8] sm:$0xff] %v841_v4 }
  0xd0   : > { %v265_v1 = vpop.f32.mrf.mxu0  ;;  %v836_v2 = vpop.f32.mrf.mxu1 }
  0xd1   : > { %351 = vst [vmem:[%s781_s28 + $0x28] sm:$0xff] %v265_v1  ;;  %v839_v3 = vpop.f32.mrf.mxu2  ;;  %v852_v18 = vpop.f32.mrf.mxu3  ;;  %v420_v21 = vmul.f32 %v265_v1, %v265_v1  ;;  %v382_v23 = vadd.f32 %v381_v20, %v265_v1  ;;  %v428_v53 = vmul.f32 %v836_v2, %v836_v2 }
  0xd2   : > { %359 = vst [vmem:[%s781_s28 + $0x68] sm:$0xff] %v836_v2 }
  0xd3   : > { %366 = vst [vmem:[%s781_s28 + $0xa0] sm:$0xff] %v839_v3  ;;  %v451_v25 = vadd.f32 %v450_v22, %v420_v21 }
  0xd4   : > { %374 = vst [vmem:[%s781_s28 + $0xe0] sm:$0xff] %v852_v18 }
  0xd8   : > { %v268_v12 = vpop.f32.mrf.mxu0  ;;  %v292_v13 = vpop.f32.mrf.mxu1 }
  0xd9   : > { %352 = vst [vmem:[%s781_s28 + $0x30] sm:$0xff] %v268_v12  ;;  %v850_v17 = vpop.f32.mrf.mxu2  ;;  %v421_v24 = vmul.f32 %v268_v12, %v268_v12  ;;  %v383_v26 = vadd.f32 %v382_v23, %v268_v12  ;;  %v860_v33 = vpop.f32.mrf.mxu3  ;;  %v433_v12 = vmul.f32 %v813_v59, %v813_v59 }
  0xda   : > { %360 = vst [vmem:[%s781_s28 + $0x70] sm:$0xff] %v292_v13  ;;  %v436_v22 = vmul.f32 %v850_v17, %v850_v17 }
  0xdb   : > { %367 = vst [vmem:[%s781_s28 + $0xa8] sm:$0xff] %v850_v17  ;;  %v452_v29 = vadd.f32 %v451_v25, %v421_v24 }
  0xdc   : > { %375 = vst [vmem:[%s781_s28 + $0xe8] sm:$0xff] %v860_v33 }
  0xe0   : > { %v271_v27 = vpop.f32.mrf.mxu0  ;;  %v295_v28 = vpop.f32.mrf.mxu1 }
  0xe1   : > { %353 = vst [vmem:[%s781_s28 + $0x38] sm:$0xff] %v271_v27  ;;  %v384_v30 = vadd.f32 %v383_v26, %v271_v27  ;;  %v422_v31 = vmul.f32 %v271_v27, %v271_v27  ;;  %v316_v32 = vpop.f32.mrf.mxu2  ;;  %v340_v47 = vpop.f32.mrf.mxu3  ;;  %v430_v1 = vmul.f32 %v295_v28, %v295_v28 }
  0xe2   : > { %361 = vst [vmem:[%s781_s28 + $0x78] sm:$0xff] %v295_v28  ;;  %v437_v25 = vmul.f32 %v316_v32, %v316_v32 }
  0xe3   : > { %v385_v35 = vadd.f32 %v384_v30, %v783_v49  ;;  %v453_v36 = vadd.f32 %v452_v29, %v422_v31  ;;  %368 = vst [vmem:[%s781_s28 + $0xb0] sm:$0xff] %v316_v32 }
  0xe4   : > { %376 = vst [vmem:[%s781_s28 + $0xf0] sm:$0xff] %v340_v47 }
  0xe5   : > { %v386_v38 = vadd.f32 %v385_v35, %v788_v51  ;;  %v454_v39 = vadd.f32 %v453_v36, %v423_v34  ;;  %v442_v36 = vmul.f32 %v841_v4, %v841_v4 }
  0xe7   : > { %v387_v41 = vadd.f32 %v386_v38, %v797_v54  ;;  %v455_v42 = vadd.f32 %v454_v39, %v424_v37 }
  0xe9   : > { %v456_v44 = vadd.f32 %v455_v42, %v425_v40  ;;  %v388_v45 = vadd.f32 %v387_v41, %v810_v58  ;;  %v319_v46 = vpop.f32.mrf.mxu2  ;;  %v429_v58 = vmul.f32 %v292_v13, %v292_v13  ;;  %v343_v7 = vpop.f32.mrf.mxu3  ;;  %v444_v41 = vmul.f32 %v860_v33, %v860_v33 }
  0xea   : > { %369 = vst [vmem:[%s781_s28 + $0xb8] sm:$0xff] %v319_v46  ;;  %v438_v26 = vmul.f32 %v319_v46, %v319_v46 }
  0xeb   : > { %v389_v49 = vadd.f32 %v388_v45, %v823_v62  ;;  %v457_v50 = vadd.f32 %v456_v44, %v426_v43  ;;  %377 = vst [vmem:[%s781_s28 + $0xf8] sm:$0xff] %v343_v7  ;;  %v445_v44 = vmul.f32 %v340_v47, %v340_v47  ;;  %v446_v45 = vmul.f32 %v343_v7, %v343_v7 }
  0xed   : > { %v390_v51 = vadd.f32 %v389_v49, %v836_v2  ;;  %v458_v54 = vadd.f32 %v457_v50, %v427_v48 }
  0xef   : > { %v459_v57 = vadd.f32 %v458_v54, %v428_v53  ;;  %v391_v61 = vadd.f32 %v390_v51, %v292_v13 }
  0xf1   : > { %v460_v5 = vadd.f32 %v459_v57, %v429_v58  ;;  %v392_v6 = vadd.f32 %v391_v61, %v295_v28 }
  0xf3   : > { %v393_v62 = vadd.f32 %v392_v6, %v791_v52  ;;  %v461_v9 = vadd.f32 %v460_v5, %v430_v1  ;;  %v435_v52 = vmul.f32 %v839_v3, %v839_v3 }
  0xf5   : > { %v394_v2 = vadd.f32 %v393_v62, %v800_v55  ;;  %v462_v11 = vadd.f32 %v461_v9, %v431_v8 }
  0xf7   : > { %v395_v13 = vadd.f32 %v394_v2, %v813_v59  ;;  %v463_v14 = vadd.f32 %v462_v11, %v432_v10 }
  0xf9   : > { %v464_v16 = vadd.f32 %v463_v14, %v433_v12  ;;  %v396_v19 = vadd.f32 %v395_v13, %v826_v63  ;;  %v439_v63 = vmul.f32 %v802_v56, %v802_v56 }
  0xfb   : > { %v397_v20 = vadd.f32 %v396_v19, %v839_v3  ;;  %v465_v21 = vadd.f32 %v464_v16, %v434_v15  ;;  %v440_v3 = vmul.f32 %v815_v60, %v815_v60 }
  0xfd   : > { %v398_v55 = vadd.f32 %v397_v20, %v850_v17  ;;  %v466_v23 = vadd.f32 %v465_v21, %v435_v52  ;;  %v441_v17 = vmul.f32 %v828_v0, %v828_v0 }
  0xff   : > { %v467_v59 = vadd.f32 %v466_v23, %v436_v22  ;;  %v399_v24 = vadd.f32 %v398_v55, %v316_v32 }
 0x101   : > { %v468_v27 = vadd.f32 %v467_v59, %v437_v25  ;;  %v400_v28 = vadd.f32 %v399_v24, %v319_v46 }
 0x103   : > { %v401_v29 = vadd.f32 %v400_v28, %v802_v56  ;;  %v469_v30 = vadd.f32 %v468_v27, %v438_v26  ;;  %v443_v56 = vmul.f32 %v852_v18, %v852_v18 }
 0x105   : > { %v402_v31 = vadd.f32 %v401_v29, %v815_v60  ;;  %v470_v34 = vadd.f32 %v469_v30, %v439_v63 }
 0x107   : > { %v403_v32 = vadd.f32 %v402_v31, %v828_v0  ;;  %v471_v35 = vadd.f32 %v470_v34, %v440_v3 }
 0x109   : > { %v472_v37 = vadd.f32 %v471_v35, %v441_v17  ;;  %v404_v38 = vadd.f32 %v403_v32, %v841_v4 }
 0x10b   : > { %v405_v39 = vadd.f32 %v404_v38, %v852_v18  ;;  %v473_v60 = vadd.f32 %v472_v37, %v442_v36  ;;  %v484_v18 = vlaneseq }
 0x10d   : > { %v406_v40 = vadd.f32 %v405_v39, %v860_v33  ;;  %v474_v0 = vadd.f32 %v473_v60, %v443_v56  ;;  %v485_v33 = vshrl.u32 %v484_v18, 7 }
 0x10f   : > { %v475_v42 = vadd.f32 %v474_v0, %v444_v41  ;;  %v407_v43 = vadd.f32 %v406_v40, %v340_v47  ;;  %vm486_vm0 = vcmp.eq.s32.totalorder %v485_v33, 0  ;;  %vm488_vm1 = vcmp.eq.s32.totalorder %v485_v33, 1 }
 0x111   : > { %v476_v46 = vadd.f32 %v475_v42, %v445_v44  ;;  %v408_v4 = vadd.f32 %v407_v43, %v343_v7 }
 0x113   : > { %v409_v48 = vrot.slane %v408_v4, 4  ;;  %v477_v49 = vadd.f32 %v476_v46, %v446_v45 }
 0x115   : > { %v410_v50 = vadd.f32 %v409_v48, %v408_v4  ;;  %v478_v51 = vrot.slane %v477_v49, 4 }
 0x117   : > { %v411_v53 = vrot.slane %v410_v50, 2  ;;  %v479_v54 = vadd.f32 %v478_v51, %v477_v49 }
 0x119   : > { %v412_v57 = vadd.f32 %v411_v53, %v410_v50  ;;  %v480_v61 = vrot.slane %v479_v54, 2 }
 0x11b   : > { %v413_v58 = vrot.slane %v412_v57, 1  ;;  %v481_v1 = vadd.f32 %v480_v61, %v479_v54 }
 0x11d   : > { %v414_v5 = vadd.f32 %v413_v58, %v412_v57  ;;  %v482_v6 = vrot.slane %v481_v1, 1 }
 0x11f   : > { %v483_v47 = vadd.f32 %v482_v6, %v481_v1  ;;  %v487_v7 = vsel %vm486_vm0, %v414_v5, 0.0 }
 0x121   : > { %v489_v8 = vsel %vm488_vm1, %v483_v47, 0.0 }
 0x122   : > { %v490_v62 = vadd.f32 %v489_v8, %v487_v7 }
 0x124   : > { %491 = vst [vmem:[%s184_s5] sm:$0xff] %v490_v62 }
 0x125 PF: > { %s14_s12 = sadd.s32 1, %s653_s12  }
 0x126   : > { %p11_p5 = scmp.ge.s32.totalorder %s14_s12, 4  }
 0x128   :  { %13 = sbr.rel (!%p11_p5) target bundleno = 1 (0x1), region = 70 }

</bundles_post_ra>
